<compile_context>
chip_gen: v7x
topology: tpu7x:2x2x1
jax: 0.10.0
libtpu: 0.0.40
codegen_flags: <defaults>
</compile_context>

<pallas_src>
import math

import jax
import jax.numpy as jnp
from jax.experimental import pallas as pl
from jax.experimental.pallas import tpu as pltpu

# ---- model hyper-parameters (small, consistent with the module) ----
B = 2        # batch
S = 8        # sequence length
D = 32       # d_model (== `size` in EncoderLayer)
H = 4        # attention heads
DH = D // H  # head dim
DFF = 64     # feed-forward hidden dim
EPS = 1e-5   # torch.nn.LayerNorm default eps

# Row offsets inside the packed (176, 128) bf16 parameter slab.
R_WQKV = 0      # rows   0: 32  -> (32, 96)  [Wq*scale | Wk | Wv]
R_WO = 32       # rows  32: 64  -> (32, 32)
R_W1 = 64       # rows  64: 96  -> (32, 64)
R_W2 = 96       # rows  96:160  -> (64, 32)
R_PV = 160      # rows 160:168  -> (8, 128)  bias / LayerNorm vectors
R_TOT = 176     # padded to a multiple of the bf16 sublane tile (16)


def _layernorm(x, gamma, beta):
    mu = jnp.mean(x, axis=-1, keepdims=True)
    var = jnp.mean((x - mu) * (x - mu), axis=-1, keepdims=True)
    return (x - mu) * jax.lax.rsqrt(var + EPS) * gamma + beta


def encoder_layer_kernel(x_ref, w_ref, out_ref):
    x = x_ref[...]                                          # (B*S, D) f32

    # Static ref-view loads from the single packed bf16 parameter slab.
    wqkv = w_ref[R_WQKV:R_WQKV + D, 0:3 * D]                # (32, 96) bf16
    wo = w_ref[R_WO:R_WO + D, 0:D]                          # (32, 32) bf16
    w1 = w_ref[R_W1:R_W1 + D, 0:DFF]                        # (32, 64) bf16
    w2 = w_ref[R_W2:R_W2 + DFF, 0:D]                        # (64, 32) bf16
    pv = w_ref[R_PV:R_PV + 8, :].astype(jnp.float32)        # (8, 128) f32

    b_qkv = pv[0:1, 0:3 * D]      # [bq*scale | bk | bv]    (1, 96)
    bo = pv[1:2, 0:D]
    g1 = pv[2:3, 0:D]
    be1 = pv[3:4, 0:D]
    g2 = pv[4:5, 0:D]
    be2 = pv[5:6, 0:D]
    b2 = pv[6:7, 0:D]
    b1 = pv[7:8, 0:DFF]

    # ---- sublayer[0]: x + self_attn(LayerNorm(x)) ----
    nx = _layernorm(x, g1, be1)                             # f32
    qkv = jnp.dot(nx.astype(jnp.bfloat16), wqkv,
                  preferred_element_type=jnp.float32) + b_qkv   # (16, 96) f32
    qkv_b = qkv.astype(jnp.bfloat16)
    q3 = qkv_b[:, 0:D].reshape(B, S, D)                     # (B, S, D) bf16
    k3 = qkv_b[:, D:2 * D].reshape(B, S, D)
    v3 = qkv_b[:, 2 * D:3 * D].reshape(B, S, D)

    # Fold (head, batch) into a single leading axis: (H*B, S, DH), built only
    # from lane slices and leading-axis concatenation (no 4-D transpose).
    def heads(t):
        return jnp.concatenate(
            [t[:, :, h * DH:(h + 1) * DH] for h in range(H)], axis=0)

    qh, kh, vh = heads(q3), heads(k3), heads(v3)            # (8, 8, 8) bf16

    # 1/sqrt(DH) is pre-folded into Wq / bq in the wrapper.
    s = jnp.einsum("nqd,nkd->nqk", qh, kh,
                   preferred_element_type=jnp.float32)       # (8, 8, 8) f32
    s = s - jnp.max(s, axis=-1, keepdims=True)
    p = jnp.exp(s)
    p = p * pl.reciprocal(jnp.sum(p, axis=-1, keepdims=True), approx=True)
    o = jnp.einsum("nqk,nkd->nqd", p.astype(jnp.bfloat16), vh,
                   preferred_element_type=jnp.float32)       # (8, 8, 8) f32

    # Un-fold heads back to (B*S, D): leading-axis slices + lane concat.
    o = jnp.concatenate([o[h * B:(h + 1) * B] for h in range(H)], axis=-1)
    o = o.reshape(B * S, D)

    attn = jnp.dot(o.astype(jnp.bfloat16), wo,
                   preferred_element_type=jnp.float32) + bo
    # TODO(synk): dropout is identity here (eval mode); no RNG mask applied.
    x1 = x + attn

    # ---- sublayer[1]: x1 + feed_forward(LayerNorm(x1)) ----
    nx2 = _layernorm(x1, g2, be2)
    hdn = jnp.maximum(
        jnp.dot(nx2.astype(jnp.bfloat16), w1,
                preferred_element_type=jnp.float32) + b1, 0.0)
    ff = jnp.dot(hdn.astype(jnp.bfloat16), w2,
                 preferred_element_type=jnp.float32) + b2

    out_ref[...] = x1 + ff


def _pack_params(p):
    """All weights + bias/LN vectors -> one (176, 128) bf16 slab (one DMA)."""
    scale = 1.0 / math.sqrt(DH)

    def pad128(w):
        w = w.astype(jnp.float32)
        return jnp.pad(w, ((0, 0), (0, 128 - w.shape[1])))

    def row(vec):
        v = vec.reshape(-1).astype(jnp.float32)
        return jnp.pad(v, (0, 128 - v.shape[0]))

    wqkv = jnp.concatenate([p["wq"] * scale, p["wk"], p["wv"]], axis=1)  # (32, 96)
    pv = jnp.stack([
        row(jnp.concatenate([(p["bq"] * scale).reshape(-1),
                             p["bk"].reshape(-1),
                             p["bv"].reshape(-1)])),   # row 0: bq*s|bk|bv (96)
        row(p["bo"]),                                  # row 1
        row(p["g1"]),                                  # row 2
        row(p["be1"]),                                 # row 3
        row(p["g2"]),                                  # row 4
        row(p["be2"]),                                 # row 5
        row(p["b2"]),                                  # row 6
        row(p["b1"]),                                  # row 7 (64 wide)
    ], axis=0)                                         # (8, 128)

    slab = jnp.concatenate([
        pad128(wqkv),                                  # rows   0: 32
        pad128(p["wo"]),                               # rows  32: 64
        pad128(p["w1"]),                               # rows  64: 96
        pad128(p["w2"]),                               # rows  96:160
        pv,                                            # rows 160:168
        jnp.zeros((R_TOT - 168, 128), jnp.float32),    # pad to 176 rows
    ], axis=0)
    return slab.astype(jnp.bfloat16)


def encoder_layer(x, params):
    """x: (B, S, D) f32.  params: dict of weights (see init_params)."""
    slab = _pack_params(params)
    xf = x.reshape(B * S, D)        # wrapper-side reshape: free XLA metadata

    flops = (2 * B * S * D * (3 * D)          # fused QKV projection
             + 2 * (B * H) * S * S * DH * 2   # scores + PV
             + 2 * B * S * D * D              # output projection
             + 2 * B * S * D * DFF * 2)       # feed-forward
    transcendentals = B * H * S * S + 2 * B * S
    bytes_accessed = xf.size * 4 * 2 + slab.size * 2

    vmem = pl.BlockSpec(memory_space=pltpu.MemorySpace.VMEM)
    f = pl.pallas_call(
        encoder_layer_kernel,
        out_shape=jax.ShapeDtypeStruct((B * S, D), jnp.float32),
        in_specs=[vmem, vmem],      # x + one packed parameter slab
        out_specs=vmem,             # no grid: whole problem in one invocation
        cost_estimate=pl.CostEstimate(flops=flops,
                                      transcendentals=transcendentals,
                                      bytes_accessed=bytes_accessed),
    )
    return f(xf, slab).reshape(B, S, D)


def init_params(key):
    ks = jax.random.split(key, 12)
    std = 0.1
    rnd = lambda k, shape: (std * jax.random.normal(k, shape)).astype(jnp.float32)
    return {
        # LayerNorm params (torch default init: ones / zeros)
        "g1": jnp.ones((1, D), jnp.float32), "be1": jnp.zeros((1, D), jnp.float32),
        "g2": jnp.ones((1, D), jnp.float32), "be2": jnp.zeros((1, D), jnp.float32),
        # attention projections
        "wq": rnd(ks[0], (D, D)), "bq": rnd(ks[1], (1, D)),
        "wk": rnd(ks[2], (D, D)), "bk": rnd(ks[3], (1, D)),
        "wv": rnd(ks[4], (D, D)), "bv": rnd(ks[5], (1, D)),
        "wo": rnd(ks[6], (D, D)), "bo": rnd(ks[7], (1, D)),
        # feed forward
        "w1": rnd(ks[8], (D, DFF)), "b1": rnd(ks[9], (1, DFF)),
        "w2": rnd(ks[10], (DFF, D)), "b2": rnd(ks[11], (1, D)),
    }


def reference(x, p):
    """Pure-JAX f32 reference for validation."""
    def ln(h, g, b):
        mu = jnp.mean(h, axis=-1, keepdims=True)
        var = jnp.mean((h - mu) ** 2, axis=-1, keepdims=True)
        return (h - mu) / jnp.sqrt(var + EPS) * g + b

    nx = ln(x, p["g1"], p["be1"])
    q = nx @ p["wq"] + p["bq"]
    k = nx @ p["wk"] + p["bk"]
    v = nx @ p["wv"] + p["bv"]
    qh = q.reshape(B, S, H, DH).transpose(0, 2, 1, 3)
    kh = k.reshape(B, S, H, DH).transpose(0, 2, 1, 3)
    vh = v.reshape(B, S, H, DH).transpose(0, 2, 1, 3)
    scores = jnp.einsum("bhqd,bhkd->bhqk", qh, kh) / math.sqrt(DH)
    pattn = jax.nn.softmax(scores, axis=-1)
    oh = jnp.einsum("bhqk,bhkd->bhqd", pattn, vh)
    o = oh.transpose(0, 2, 1, 3).reshape(B, S, D) @ p["wo"] + p["bo"]
    x1 = x + o
    nx2 = ln(x1, p["g2"], p["be2"])
    ff = jnp.maximum(nx2 @ p["w1"] + p["b1"], 0.0) @ p["w2"] + p["b2"]
    return x1 + ff


if __name__ == "__main__":
    key = jax.random.PRNGKey(0)
    kx, kp = jax.random.split(key)
    x = jax.random.normal(kx, (B, S, D), dtype=jnp.float32)
    params = init_params(kp)

    out = jax.block_until_ready(encoder_layer(x, params))
    ref = jax.block_until_ready(reference(x, params))

    assert out.shape == (B, S, D), out.shape
    # bf16 MXU operands + approximate EUP reciprocal -> slightly looser tol.
    assert jnp.allclose(out, ref, atol=3e-2, rtol=3e-2), (
        float(jnp.max(jnp.abs(out - ref))))

    print("KERNEL_OK")
</pallas_src>

<mosaic_0001>
module attributes {stable_mosaic.version = 11 : i64} {
  func.func @encoder_layer_kernel(%arg0: memref<16x32xf32, #tpu.memory_space<vmem>>, %arg1: memref<176x128xbf16, #tpu.memory_space<vmem>>, %arg2: memref<16x32xf32, #tpu.memory_space<vmem>>) attributes {dimension_semantics = [], scalar_prefetch = 0 : i64, scratch_operands = 0 : i64, tpu.core_type = #tpu.core_type<tc>} {
    %c0 = arith.constant 0 : index
    %c0_0 = arith.constant 0 : index
    %0 = vector.load %arg0[%c0, %c0_0] : memref<16x32xf32, #tpu.memory_space<vmem>>, vector<16x32xf32>
    %c0_1 = arith.constant 0 : index
    %c0_2 = arith.constant 0 : index
    %1 = vector.load %arg1[%c0_1, %c0_2] : memref<176x128xbf16, #tpu.memory_space<vmem>>, vector<32x96xbf16>
    %c32 = arith.constant 32 : index
    %c0_3 = arith.constant 0 : index
    %2 = vector.load %arg1[%c32, %c0_3] : memref<176x128xbf16, #tpu.memory_space<vmem>>, vector<32x32xbf16>
    %c64 = arith.constant 64 : index
    %c0_4 = arith.constant 0 : index
    %3 = vector.load %arg1[%c64, %c0_4] : memref<176x128xbf16, #tpu.memory_space<vmem>>, vector<32x64xbf16>
    %c96 = arith.constant 96 : index
    %c0_5 = arith.constant 0 : index
    %4 = vector.load %arg1[%c96, %c0_5] : memref<176x128xbf16, #tpu.memory_space<vmem>>, vector<64x32xbf16>
    %c160 = arith.constant 160 : index
    %c0_6 = arith.constant 0 : index
    %5 = vector.load %arg1[%c160, %c0_6] : memref<176x128xbf16, #tpu.memory_space<vmem>>, vector<8x128xbf16>
    %6 = arith.extf %5 : vector<8x128xbf16> to vector<8x128xf32>
    %7 = vector.extract_strided_slice %6 {offsets = [0, 0], sizes = [1, 96], strides = [1, 1]} : vector<8x128xf32> to vector<1x96xf32>
    %8 = vector.extract_strided_slice %6 {offsets = [1, 0], sizes = [1, 32], strides = [1, 1]} : vector<8x128xf32> to vector<1x32xf32>
    %9 = vector.extract_strided_slice %6 {offsets = [2, 0], sizes = [1, 32], strides = [1, 1]} : vector<8x128xf32> to vector<1x32xf32>
    %10 = vector.extract_strided_slice %6 {offsets = [3, 0], sizes = [1, 32], strides = [1, 1]} : vector<8x128xf32> to vector<1x32xf32>
    %11 = vector.extract_strided_slice %6 {offsets = [4, 0], sizes = [1, 32], strides = [1, 1]} : vector<8x128xf32> to vector<1x32xf32>
    %12 = vector.extract_strided_slice %6 {offsets = [5, 0], sizes = [1, 32], strides = [1, 1]} : vector<8x128xf32> to vector<1x32xf32>
    %13 = vector.extract_strided_slice %6 {offsets = [6, 0], sizes = [1, 32], strides = [1, 1]} : vector<8x128xf32> to vector<1x32xf32>
    %14 = vector.extract_strided_slice %6 {offsets = [7, 0], sizes = [1, 64], strides = [1, 1]} : vector<8x128xf32> to vector<1x64xf32>
    %cst = arith.constant dense<0.000000e+00> : vector<16xf32>
    %15 = vector.multi_reduction <add>, %0, %cst [1] : vector<16x32xf32> to vector<16xf32>
    %16 = vector.shape_cast %15 : vector<16xf32> to vector<16x1xf32>
    %cst_7 = arith.constant 3.200000e+01 : f32
    %17 = vector.broadcast %cst_7 : f32 to vector<16x1xf32>
    %18 = arith.divf %16, %17 : vector<16x1xf32>
    %19 = vector.broadcast %18 : vector<16x1xf32> to vector<16x32xf32>
    %20 = arith.subf %0, %19 : vector<16x32xf32>
    %21 = vector.broadcast %18 : vector<16x1xf32> to vector<16x32xf32>
    %22 = arith.subf %0, %21 : vector<16x32xf32>
    %23 = arith.mulf %20, %22 : vector<16x32xf32>
    %cst_8 = arith.constant dense<0.000000e+00> : vector<16xf32>
    %24 = vector.multi_reduction <add>, %23, %cst_8 [1] : vector<16x32xf32> to vector<16xf32>
    %25 = vector.shape_cast %24 : vector<16xf32> to vector<16x1xf32>
    %cst_9 = arith.constant 3.200000e+01 : f32
    %26 = vector.broadcast %cst_9 : f32 to vector<16x1xf32>
    %27 = arith.divf %25, %26 : vector<16x1xf32>
    %28 = vector.broadcast %18 : vector<16x1xf32> to vector<16x32xf32>
    %29 = arith.subf %0, %28 : vector<16x32xf32>
    %cst_10 = arith.constant 9.99999974E-6 : f32
    %30 = vector.broadcast %cst_10 : f32 to vector<16x1xf32>
    %31 = arith.addf %27, %30 : vector<16x1xf32>
    %32 = math.rsqrt %31 : vector<16x1xf32>
    %33 = vector.broadcast %32 : vector<16x1xf32> to vector<16x32xf32>
    %34 = arith.mulf %29, %33 : vector<16x32xf32>
    %35 = vector.broadcast %9 : vector<1x32xf32> to vector<16x32xf32>
    %36 = arith.mulf %34, %35 : vector<16x32xf32>
    %37 = vector.broadcast %10 : vector<1x32xf32> to vector<16x32xf32>
    %38 = arith.addf %36, %37 : vector<16x32xf32>
    %39 = arith.truncf %38 : vector<16x32xf32> to vector<16x32xbf16>
    %cst_11 = arith.constant dense<0.000000e+00> : vector<16x96xf32>
    %40 = tpu.matmul %39, %1, %cst_11 {dimension_numbers = #tpu.dot_dimension_numbers<[1], [0], [0], [1], [0, 0, 1, 1], [], []>} : vector<16x32xbf16>, vector<32x96xbf16>, vector<16x96xf32> -> vector<16x96xf32>
    %41 = vector.broadcast %7 : vector<1x96xf32> to vector<16x96xf32>
    %42 = arith.addf %40, %41 : vector<16x96xf32>
    %43 = arith.truncf %42 : vector<16x96xf32> to vector<16x96xbf16>
    %44 = vector.extract_strided_slice %43 {offsets = [0, 0], sizes = [16, 32], strides = [1, 1]} : vector<16x96xbf16> to vector<16x32xbf16>
    %45 = vector.shape_cast %44 : vector<16x32xbf16> to vector<2x8x32xbf16>
    %46 = vector.extract_strided_slice %43 {offsets = [0, 32], sizes = [16, 32], strides = [1, 1]} : vector<16x96xbf16> to vector<16x32xbf16>
    %47 = vector.shape_cast %46 : vector<16x32xbf16> to vector<2x8x32xbf16>
    %48 = vector.extract_strided_slice %43 {offsets = [0, 64], sizes = [16, 32], strides = [1, 1]} : vector<16x96xbf16> to vector<16x32xbf16>
    %49 = vector.shape_cast %48 : vector<16x32xbf16> to vector<2x8x32xbf16>
    %50 = vector.extract_strided_slice %45 {offsets = [0, 0, 0], sizes = [2, 8, 8], strides = [1, 1, 1]} : vector<2x8x32xbf16> to vector<2x8x8xbf16>
    %51 = vector.extract_strided_slice %45 {offsets = [0, 0, 8], sizes = [2, 8, 8], strides = [1, 1, 1]} : vector<2x8x32xbf16> to vector<2x8x8xbf16>
    %52 = vector.extract_strided_slice %45 {offsets = [0, 0, 16], sizes = [2, 8, 8], strides = [1, 1, 1]} : vector<2x8x32xbf16> to vector<2x8x8xbf16>
    %53 = vector.extract_strided_slice %45 {offsets = [0, 0, 24], sizes = [2, 8, 8], strides = [1, 1, 1]} : vector<2x8x32xbf16> to vector<2x8x8xbf16>
    %54 = tpu.concatenate %50, %51, %52, %53 in 0 : vector<2x8x8xbf16>, vector<2x8x8xbf16>, vector<2x8x8xbf16>, vector<2x8x8xbf16> -> vector<8x8x8xbf16>
    %55 = vector.extract_strided_slice %47 {offsets = [0, 0, 0], sizes = [2, 8, 8], strides = [1, 1, 1]} : vector<2x8x32xbf16> to vector<2x8x8xbf16>
    %56 = vector.extract_strided_slice %47 {offsets = [0, 0, 8], sizes = [2, 8, 8], strides = [1, 1, 1]} : vector<2x8x32xbf16> to vector<2x8x8xbf16>
    %57 = vector.extract_strided_slice %47 {offsets = [0, 0, 16], sizes = [2, 8, 8], strides = [1, 1, 1]} : vector<2x8x32xbf16> to vector<2x8x8xbf16>
    %58 = vector.extract_strided_slice %47 {offsets = [0, 0, 24], sizes = [2, 8, 8], strides = [1, 1, 1]} : vector<2x8x32xbf16> to vector<2x8x8xbf16>
    %59 = tpu.concatenate %55, %56, %57, %58 in 0 : vector<2x8x8xbf16>, vector<2x8x8xbf16>, vector<2x8x8xbf16>, vector<2x8x8xbf16> -> vector<8x8x8xbf16>
    %60 = vector.extract_strided_slice %49 {offsets = [0, 0, 0], sizes = [2, 8, 8], strides = [1, 1, 1]} : vector<2x8x32xbf16> to vector<2x8x8xbf16>
    %61 = vector.extract_strided_slice %49 {offsets = [0, 0, 8], sizes = [2, 8, 8], strides = [1, 1, 1]} : vector<2x8x32xbf16> to vector<2x8x8xbf16>
    %62 = vector.extract_strided_slice %49 {offsets = [0, 0, 16], sizes = [2, 8, 8], strides = [1, 1, 1]} : vector<2x8x32xbf16> to vector<2x8x8xbf16>
    %63 = vector.extract_strided_slice %49 {offsets = [0, 0, 24], sizes = [2, 8, 8], strides = [1, 1, 1]} : vector<2x8x32xbf16> to vector<2x8x8xbf16>
    %64 = tpu.concatenate %60, %61, %62, %63 in 0 : vector<2x8x8xbf16>, vector<2x8x8xbf16>, vector<2x8x8xbf16>, vector<2x8x8xbf16> -> vector<8x8x8xbf16>
    "tpu.trace_start"() <{level = 10 : i32, message = "nqd,nkd->nqk"}> : () -> ()
    %cst_12 = arith.constant dense<0.000000e+00> : vector<8x8x8xf32>
    %65 = tpu.matmul %54, %59, %cst_12 {dimension_numbers = #tpu.dot_dimension_numbers<[2], [2], [1], [1], [0, 0, 0, 1, 1, 1], [0], [0]>} : vector<8x8x8xbf16>, vector<8x8x8xbf16>, vector<8x8x8xf32> -> vector<8x8x8xf32>
    "tpu.trace_stop"() : () -> ()
    %cst_13 = arith.constant dense<0xFF800000> : vector<8x8xf32>
    %66 = vector.multi_reduction <maximumf>, %65, %cst_13 [2] : vector<8x8x8xf32> to vector<8x8xf32>
    %67 = vector.shape_cast %66 : vector<8x8xf32> to vector<8x8x1xf32>
    %68 = vector.broadcast %67 : vector<8x8x1xf32> to vector<8x8x8xf32>
    %69 = arith.subf %65, %68 : vector<8x8x8xf32>
    %70 = math.exp %69 : vector<8x8x8xf32>
    %cst_14 = arith.constant dense<0.000000e+00> : vector<8x8xf32>
    %71 = vector.multi_reduction <add>, %70, %cst_14 [2] : vector<8x8x8xf32> to vector<8x8xf32>
    %72 = vector.shape_cast %71 : vector<8x8xf32> to vector<8x8x1xf32>
    %73 = tpu.reciprocal %72 {approx = true} : vector<8x8x1xf32> -> vector<8x8x1xf32>
    %74 = vector.broadcast %73 : vector<8x8x1xf32> to vector<8x8x8xf32>
    %75 = arith.mulf %70, %74 : vector<8x8x8xf32>
    %76 = arith.truncf %75 : vector<8x8x8xf32> to vector<8x8x8xbf16>
    "tpu.trace_start"() <{level = 10 : i32, message = "nqk,nkd->nqd"}> : () -> ()
    %cst_15 = arith.constant dense<0.000000e+00> : vector<8x8x8xf32>
    %77 = tpu.matmul %76, %64, %cst_15 {dimension_numbers = #tpu.dot_dimension_numbers<[2], [1], [1], [2], [0, 0, 0, 1, 1, 2], [0], [0]>} : vector<8x8x8xbf16>, vector<8x8x8xbf16>, vector<8x8x8xf32> -> vector<8x8x8xf32>
    "tpu.trace_stop"() : () -> ()
    %78 = vector.extract_strided_slice %77 {offsets = [0, 0, 0], sizes = [2, 8, 8], strides = [1, 1, 1]} : vector<8x8x8xf32> to vector<2x8x8xf32>
    %79 = vector.extract_strided_slice %77 {offsets = [2, 0, 0], sizes = [2, 8, 8], strides = [1, 1, 1]} : vector<8x8x8xf32> to vector<2x8x8xf32>
    %80 = vector.extract_strided_slice %77 {offsets = [4, 0, 0], sizes = [2, 8, 8], strides = [1, 1, 1]} : vector<8x8x8xf32> to vector<2x8x8xf32>
    %81 = vector.extract_strided_slice %77 {offsets = [6, 0, 0], sizes = [2, 8, 8], strides = [1, 1, 1]} : vector<8x8x8xf32> to vector<2x8x8xf32>
    %82 = tpu.concatenate %78, %79, %80, %81 in 2 : vector<2x8x8xf32>, vector<2x8x8xf32>, vector<2x8x8xf32>, vector<2x8x8xf32> -> vector<2x8x32xf32>
    %83 = vector.shape_cast %82 : vector<2x8x32xf32> to vector<16x32xf32>
    %84 = arith.truncf %83 : vector<16x32xf32> to vector<16x32xbf16>
    %cst_16 = arith.constant dense<0.000000e+00> : vector<16x32xf32>
    %85 = tpu.matmul %84, %2, %cst_16 {dimension_numbers = #tpu.dot_dimension_numbers<[1], [0], [0], [1], [0, 0, 1, 1], [], []>} : vector<16x32xbf16>, vector<32x32xbf16>, vector<16x32xf32> -> vector<16x32xf32>
    %86 = vector.broadcast %8 : vector<1x32xf32> to vector<16x32xf32>
    %87 = arith.addf %85, %86 : vector<16x32xf32>
    %88 = arith.addf %0, %87 : vector<16x32xf32>
    %cst_17 = arith.constant dense<0.000000e+00> : vector<16xf32>
    %89 = vector.multi_reduction <add>, %88, %cst_17 [1] : vector<16x32xf32> to vector<16xf32>
    %90 = vector.shape_cast %89 : vector<16xf32> to vector<16x1xf32>
    %cst_18 = arith.constant 3.200000e+01 : f32
    %91 = vector.broadcast %cst_18 : f32 to vector<16x1xf32>
    %92 = arith.divf %90, %91 : vector<16x1xf32>
    %93 = vector.broadcast %92 : vector<16x1xf32> to vector<16x32xf32>
    %94 = arith.subf %88, %93 : vector<16x32xf32>
    %95 = vector.broadcast %92 : vector<16x1xf32> to vector<16x32xf32>
    %96 = arith.subf %88, %95 : vector<16x32xf32>
    %97 = arith.mulf %94, %96 : vector<16x32xf32>
    %cst_19 = arith.constant dense<0.000000e+00> : vector<16xf32>
    %98 = vector.multi_reduction <add>, %97, %cst_19 [1] : vector<16x32xf32> to vector<16xf32>
    %99 = vector.shape_cast %98 : vector<16xf32> to vector<16x1xf32>
    %cst_20 = arith.constant 3.200000e+01 : f32
    %100 = vector.broadcast %cst_20 : f32 to vector<16x1xf32>
    %101 = arith.divf %99, %100 : vector<16x1xf32>
    %102 = vector.broadcast %92 : vector<16x1xf32> to vector<16x32xf32>
    %103 = arith.subf %88, %102 : vector<16x32xf32>
    %cst_21 = arith.constant 9.99999974E-6 : f32
    %104 = vector.broadcast %cst_21 : f32 to vector<16x1xf32>
    %105 = arith.addf %101, %104 : vector<16x1xf32>
    %106 = math.rsqrt %105 : vector<16x1xf32>
    %107 = vector.broadcast %106 : vector<16x1xf32> to vector<16x32xf32>
    %108 = arith.mulf %103, %107 : vector<16x32xf32>
    %109 = vector.broadcast %11 : vector<1x32xf32> to vector<16x32xf32>
    %110 = arith.mulf %108, %109 : vector<16x32xf32>
    %111 = vector.broadcast %12 : vector<1x32xf32> to vector<16x32xf32>
    %112 = arith.addf %110, %111 : vector<16x32xf32>
    %113 = arith.truncf %112 : vector<16x32xf32> to vector<16x32xbf16>
    %cst_22 = arith.constant dense<0.000000e+00> : vector<16x64xf32>
    %114 = tpu.matmul %113, %3, %cst_22 {dimension_numbers = #tpu.dot_dimension_numbers<[1], [0], [0], [1], [0, 0, 1, 1], [], []>} : vector<16x32xbf16>, vector<32x64xbf16>, vector<16x64xf32> -> vector<16x64xf32>
    %115 = vector.broadcast %14 : vector<1x64xf32> to vector<16x64xf32>
    %116 = arith.addf %114, %115 : vector<16x64xf32>
    %cst_23 = arith.constant 0.000000e+00 : f32
    %117 = vector.broadcast %cst_23 : f32 to vector<16x64xf32>
    %118 = arith.maximumf %116, %117 : vector<16x64xf32>
    %119 = arith.truncf %118 : vector<16x64xf32> to vector<16x64xbf16>
    %cst_24 = arith.constant dense<0.000000e+00> : vector<16x32xf32>
    %120 = tpu.matmul %119, %4, %cst_24 {dimension_numbers = #tpu.dot_dimension_numbers<[1], [0], [0], [1], [0, 0, 1, 1], [], []>} : vector<16x64xbf16>, vector<64x32xbf16>, vector<16x32xf32> -> vector<16x32xf32>
    %121 = vector.broadcast %13 : vector<1x32xf32> to vector<16x32xf32>
    %122 = arith.addf %120, %121 : vector<16x32xf32>
    %123 = arith.addf %88, %122 : vector<16x32xf32>
    %c0_25 = arith.constant 0 : index
    %c0_26 = arith.constant 0 : index
    %124 = vector.load %arg2[%c0_25, %c0_26] : memref<16x32xf32, #tpu.memory_space<vmem>>, vector<16x32xf32>
    tpu.vector_store %arg2[%c0_25, %c0_26], %123 {strides = array<i32>} : memref<16x32xf32, #tpu.memory_space<vmem>>, vector<16x32xf32>,
    return
  }
}

</mosaic_0001>

<bundles_post_ra>
// kernel: tpu_custom_call.1
= control target key start
LH: loop header
LB: loop body
LE: loop exit
PB: predicated region body
PF: predicated region fallthrough
CT: control target
= control target key end

     0   :  { %7 = vsyncpa [#allocation3], 0  ;;  %s2060_s0 = inlined_call_operand.hbm [shape: f32[16,32], index: 0, kind: input, shape index: {}]   ;;  %s2061_s1 = inlined_call_operand.hbm [shape: bf16[176,128], index: 1, kind: input, shape index: {}]   ;;  %s2062_s2 = inlined_call_operand.hbm [shape: f32[16,32], index: 2, kind: output, shape index: {}]  }
   0x1   :  { %8 = vsyncpa [#allocation6], 0 }
   0x2   :  { %9 = vsyncpa [#allocation4], 0  ;;  %s1724_s9 = smov [#allocation2]   ;;  %s1652_s13 = scalar_lea.hbm %s2060_s0, 256 }
   0x3   :  { %s15_s10 = sshll.u32 %s1724_s9, 4  ;;  %p1653_p0 = scmp.ne.s32.totalorder %s2060_s0, %s1652_s13  ;;  %s16_s10 = int_to_ptr.vmem [resolvable:$true] %s15_s10 }
   0x4   :  { %p1656_p1 = scmp.lt.u32.totalorder %s1652_s13, %s2060_s0 }
   0x6   :  { %p1658_p2 = pnand %p1656_p1, %p1653_p0 }
   0x8   :  { %1661 = shalt.err (!%p1658_p2)
}
   0x9   :  { %s1662_s18 = scalar_lea.vmem %s16_s10, 256  ;;  %p1667_p4 = scmp.lt.s32.totalorder %s16_s10, %s16_s10 }
   0xa   :  { %p1663_p3 = scmp.ne.s32.totalorder %s16_s10, %s1662_s18  ;;  %p1668_p5 = scmp.lt.s32.totalorder %s1662_s18, %s1662_s18 }
   0xc   :  { %p1669_p6 = por %p1668_p5, %p1667_p4 }
   0xe   :  { %p1670_p7 = pnand %p1669_p6, %p1663_p3 }
  0x10   :  { %1673 = shalt.err (!%p1670_p7)
}
  0x11   :  { %s1725_s19 = smov 128   ;;  %s1726_s20 = smov 8  }
  0x12   :  { %21 = dma.hbm_to_vmem [thread:$0]  %s2060_s0, 256, %s16_s10, [#allocation3], %s1725_s19, %s1725_s19, %s1726_s20  }
  0x13   :  { %s1727_s23 = smov [#allocation5]   ;;  %s1674_s27 = scalar_lea.hbm %s2061_s1, 1408 }
  0x14   :  { %s27_s24 = sshll.u32 %s1727_s23, 4  ;;  %p1675_p8 = scmp.ne.s32.totalorder %s2061_s1, %s1674_s27  ;;  %s28_s24 = int_to_ptr.vmem [resolvable:$true] %s27_s24 }
  0x15   :  { %p1678_p9 = scmp.lt.u32.totalorder %s1674_s27, %s2061_s1 }
  0x17   :  { %p1680_p10 = pnand %p1678_p9, %p1675_p8 }
  0x19   :  { %1683 = shalt.err (!%p1680_p10)
}
  0x1a   :  { %s1684_s4 = scalar_lea.vmem %s28_s24, 1408  ;;  %p1689_p12 = scmp.lt.s32.totalorder %s28_s24, %s28_s24 }
  0x1b   :  { %p1685_p11 = scmp.ne.s32.totalorder %s28_s24, %s1684_s4  ;;  %p1690_p13 = scmp.lt.s32.totalorder %s1684_s4, %s1684_s4 }
  0x1d   :  { %p1691_p0 = por %p1690_p13, %p1689_p12 }
  0x1f   :  { %p1692_p1 = pnand %p1691_p0, %p1685_p11 }
  0x21   :  { %1695 = shalt.err (!%p1692_p1)
}
  0x22   :  { %s1728_s0 = smov 64   ;;  %s1729_s5 = smov 4  }
  0x23   :  { %33 = dma.hbm_to_vmem [thread:$0]  %s2061_s1, 1408, %s28_s24, [#allocation6], %s1728_s0, %s1728_s0, %s1729_s5  }
  0x24   :  { %1718 = dma.done.wait [#allocation3], 256  }
  0x25   :  { %1719 = vsyncadd [#allocation3], 4294967040 }
  0x26   :  { %1720 = dma.done.wait [#allocation6], 1408  }
  0x27   :  { %1721 = vsyncadd [#allocation6], 4294965888  ;;  %vm65_vm0 = vcmask 261120   ;;  %v1783_v0 = vld [vmem:[#allocation2] sm:$0xff]  ;;  %v1785_v1 = vld [vmem:[#allocation2 + $0x8] sm:$0xff]  ;;  %v1730_v15 = vmov 0.0   ;;  %v93_v21 = vlaneseq }
  0x28   :  { %v66_v2 = vsel %vm65_vm0, %v1783_v0, 0.0  ;;  %v69_v3 = vsel %vm65_vm0, %v1785_v1, 0.0  ;;  %v1602_v14 = vld [vmem:[#allocation5] sm:$0xff]   ;;  %1440 = vmatprep.subr.bf16.mxu0 %v1730_v15  ;;  %1448 = vmatprep.subr.bf16.mxu1 %v1730_v15  ;;  %v1603_v16 = vld [vmem:[#allocation5 + $0x8] sm:$0xff]   ;;  %vm1731_vm1 = vmmov 0   ;;  %s1732_s1 = smov 120  }
  0x29   :  { %67 = vadd.xlane.f32.xlu0 %v66_v2  ;;  %1441 = vmatpush3.bf16.msra.mxu0 %v1602_v14  ;;  %v1803_v24 = vshrl.u32 %v93_v21, 7  ;;  %v63_v25 = vld [vmem:[#allocation5 + $0x50] sm:$0xf]  ;;  %s1733_s8 = smov 104   ;;  %s1734_s9 = smov 112   ;;  %vm186_vm2 = vcmask 64512  }
  0x2a   :  { %1444 = vmatprep.mubr.msk.bf16.mxu0 %vm1731_vm1, %v1730_v15  ;;  %1442 = vmatprep.subr.bf16.mxu0 %v1730_v15  ;;  %v1805_v26 = vunpack.c.l.bf16 %v63_v25  ;;  %s1735_s10 = smov 96   ;;  %vm682_vm3 = vcmask 1043456   ;;  %s1736_s11 = smov 16   ;;  %vm1088_vm4 = vcmask 130048   ;;  %vm1091_vm5 = vcmask 195584  }
  0x2b   :  { %1450 = vmatprep.mubr.msk.bf16.mxu1 %vm1731_vm1, %v1730_v15  ;;  %v95_v27 = vsub.s32 2, %v1803_v24  ;;  %v101_v31 = vsub.s32 3, %v1803_v24  ;;  %v108_v40 = vsub.s32 0, %v1803_v24  ;;  %s1737_s12 = smov 24   ;;  %vm1287_vm6 = vcmask 523264   ;;  %s1738_s13 = smov [#allocation7]  }
  0x2c   :  { %s1341_s14 = sshll.u32 %s1738_s13, 4  ;;  %s1342_s14 = int_to_ptr.vmem [resolvable:$true] %s1341_s14 }
  0x2d   :  { %70 = vadd.xlane.f32.xlu0 %v69_v3  ;;  %1443 = vmatpush3.bf16.msra.mxu0 %v1603_v16  ;;  %v96_v30 = vrot.slane %v1805_v26, %v95_v27  ;;  %v102_v35 = vrot.slane %v1805_v26, %v101_v31  ;;  %v109_v41 = vrot.slane %v1805_v26, %v108_v40  ;;  %s1696_s15 = scalar_lea.vmem %s1342_s14, 256  ;;  %p1701_p3 = scmp.lt.s32.totalorder %s1342_s14, %s1342_s14 }
  0x2e   :  { %1454 = vmatprep.subr.bf16.mxu0 %v1730_v15  ;;  %p1697_p2 = scmp.ne.s32.totalorder %s1342_s14, %s1696_s15  ;;  %p1702_p4 = scmp.lt.s32.totalorder %s1696_s15, %s1696_s15 }
  0x30   :  { %p1703_p5 = por %p1702_p4, %p1701_p3 }
  0x32   :  { %p1704_p6 = pnand %p1703_p5, %p1697_p2 }
  0xb6   :  { %v68_v4 = vpop.xlane.xlu0 %67 }
  0xb7   :  { %v73_v5 = vmul.f32 0.03125, %v68_v4 }
  0xb9   :  { %v75_v6 = vsub.f32 %v1783_v0, %v73_v5 }
  0xba   :  { %v71_v7 = vpop.xlane.xlu0 %70 }
  0xbb   :  { %v74_v8 = vmul.f32 0.03125, %v71_v7  ;;  %v77_v9 = vmul.f32 %v75_v6, %v75_v6 }
  0xbd   :  { %v76_v10 = vsub.f32 %v1785_v1, %v74_v8  ;;  %v79_v11 = vsel %vm65_vm0, %v77_v9, 0.0 }
  0xbe   :  { %80 = vadd.xlane.f32.xlu1 %v79_v11 }
  0xbf   :  { %v78_v12 = vmul.f32 %v76_v10, %v76_v10 }
  0xc1   :  { %v82_v13 = vsel %vm65_vm0, %v78_v12, 0.0 }
  0xc2   :  { %83 = vadd.xlane.f32.xlu1 %v82_v13 }
 0x14b   :  { %v81_v17 = vpop.xlane.xlu1 %80 }
 0x14c   :  { %v85_v18 = vmul.f32 0.03125, %v81_v17 }
 0x14e   :  { %v87_v19 = vadd.f32 1e-05, %v85_v18 }
 0x14f   :  { %v84_v20 = vpop.xlane.xlu1 %83 }
 0x150   :  { %1612 = vrsqrt.f32 %v87_v19  ;;  %v86_v22 = vmul.f32 0.03125, %v84_v20 }
 0x152   :  { %v88_v23 = vadd.f32 1e-05, %v86_v22 }
 0x154   :  { %1614 = vrsqrt.f32 %v88_v23 }
 0x15a   :  { %v1613_v28 = vpop.eup %1612 }
 0x15b   :  { %v91_v29 = vmul.f32 %v1613_v28, %v75_v6 }
 0x15d   :  { %v97_v34 = vmul.f32 %v96_v30, %v91_v29 }
 0x15e   :  { %v1615_v32 = vpop.eup %1614 }
 0x15f   :  { %v92_v33 = vmul.f32 %v1615_v32, %v76_v10  ;;  %v103_v37 = vadd.f32 %v102_v35, %v97_v34 }
 0x161   :  { %v98_v36 = vmul.f32 %v96_v30, %v92_v33 }
 0x163   :  { %v104_v38 = vadd.f32 %v102_v35, %v98_v36 }
 0x165   :  { %v105_v39 = vpack.c.bf16 %v104_v38, %v103_v37 }
 0x167   :  { %1445 = vmatmul.mubr.msk.bf16.vlgmr.msra.gmra.mrb[0].mxu0 %vm65_vm0, %v105_v39 }
 0x168   :  { %1456 = vmatprep.mubr.msk.bf16.mxu0 %vm1731_vm1, %v1730_v15 }
 0x23a   :  { %v159_v42 = vpop.f32.mrb[0].mxu0 }
 0x23b   :  { %v160_v43 = vadd.f32 %v159_v42, %v109_v41  ;;  %v1446_v44 = vpop.f32.mrb[1].mxu0 }
 0x23c   :  { %v162_v45 = vpop.f32.mrb[2].mxu0 }
 0x23d   :  { %v1816_v46 = vpack.c.bf16 %v160_v43, %v160_v43  ;;  %v163_v47 = vadd.f32 %v162_v45, %v109_v41  ;;  %v1447_v48 = vpop.f32.mrb[3].mxu0 }
 0x23f   :  { %v1818_v49 = vpack.c.bf16 %v163_v47, %v163_v47  ;;  %172 = vrot.lane.b32.xlu0 %v1816_v46, %s1732_s1 }
 0x241   :  { %174 = vrot.lane.b32.xlu1 %v1818_v49, %s1732_s1 }
 0x243   :  { %180 = vrot.lane.b32.xlu0 %v1816_v46, %s1733_s8 }
 0x245   :  { %176 = vrot.lane.b32.xlu1 %v1816_v46, %s1734_s9 }
 0x247   :  { %184 = vrot.lane.b32.xlu0 %v1816_v46, %s1735_s10 }
 0x249   :  { %178 = vrot.lane.b32.xlu1 %v1818_v49, %s1734_s9 }
 0x24d   :  { %182 = vrot.lane.b32.xlu1 %v1818_v49, %s1733_s8 }
 0x251   :  { %233 = vrot.lane.b32.xlu1 %v1818_v49, %s1735_s10 }
 0x2b1   :  { %v173_v50 = vpop.permute.xlu0 %172 }
 0x2b2   :  { %v1828_v51 = vcombine.low %v173_v50, %v173_v50 }
 0x2b3   :  { %v175_v52 = vpop.permute.xlu1 %174 }
 0x2b4   :  { %v1830_v53 = vcombine.low %v175_v52, %v175_v52  ;;  %283 = vrot.lane.b32.xlu0 %v1828_v51, %s1735_s10 }
 0x2b5   :  { %v181_v54 = vpop.permute.xlu0 %180 }
 0x2b6   :  { %333 = vrot.lane.b32.xlu1 %v1830_v53, %s1735_s10  ;;  %v1838_v60 = vcombine.low %v181_v54, %v181_v54 }
 0x2b7   :  { %v177_v55 = vpop.permute.xlu1 %176 }
 0x2b8   :  { %v1834_v56 = vcombine.low %v177_v55, %v177_v55 }
 0x2b9   :  { %v185_v57 = vpop.permute.xlu0 %184 }
 0x2ba   :  { %383 = vrot.lane.b32.xlu0 %v1834_v56, %s1735_s10  ;;  %v191_v58 = vsel %vm186_vm2, %v185_v57, 0 }
 0x2bb   :  { %1449 = vmatpush3.bf16.xpose.msra.mxu1 %v191_v58  ;;  %v179_v59 = vpop.permute.xlu1 %178 }
 0x2bc   :  { %v1840_v61 = vcombine.low %v179_v59, %v179_v59  ;;  %1460 = vmatprep.subr.bf16.mxu1 %v1730_v15 }
 0x2be   :  { %483 = vrot.lane.b32.xlu0 %v1838_v60, %s1735_s10  ;;  %433 = vrot.lane.b32.xlu1 %v1840_v61, %s1735_s10 }
 0x2bf   :  { %v183_v62 = vpop.permute.xlu1 %182 }
 0x2c0   :  { %v1845_v63 = vcombine.low %v183_v62, %v183_v62 }
 0x2c2   :  { %1451 = vmatmul.mubr.msk.bf16.vlgmr.msra.gmra.mrb[0].mxu1 %vm186_vm2, %v1816_v46  ;;  %533 = vrot.lane.b32.xlu1 %v1845_v63, %s1735_s10 }
 0x2c3   :  { %v234_v2 = vpop.permute.xlu1 %233  ;;  %1462 = vmatprep.mubr.msk.bf16.mxu1 %vm1731_vm1, %v1730_v15 }
 0x2c4   :  { %v239_v3 = vsel %vm186_vm2, %v234_v2, 0 }
 0x2c5   :  { %1455 = vmatpush3.bf16.xpose.msra.mxu0 %v239_v3 }
 0x2c6   :  { %1466 = vmatprep.subr.bf16.mxu0 %v1730_v15 }
 0x2cc   :  { %1457 = vmatmul.mubr.msk.bf16.vlgmr.msra.gmra.mrb[4].mxu0 %vm186_vm2, %v1818_v49 }
 0x2cd   :  { %1468 = vmatprep.mubr.msk.bf16.mxu0 %vm1731_vm1, %v1730_v15 }
 0x326   :  { %v284_v4 = vpop.permute.xlu0 %283 }
 0x327   :  { %v289_v5 = vsel %vm186_vm2, %v284_v4, 0 }
 0x328   :  { %1461 = vmatpush3.bf16.xpose.msra.mxu1 %v289_v5  ;;  %v334_v6 = vpop.permute.xlu1 %333 }
 0x329   :  { %v339_v7 = vsel %vm186_vm2, %v334_v6, 0  ;;  %1472 = vmatprep.subr.bf16.mxu1 %v1730_v15 }
 0x32a   :  { %1467 = vmatpush3.bf16.xpose.msra.mxu0 %v339_v7 }
 0x32b   :  { %1478 = vmatprep.subr.bf16.mxu0 %v1730_v15 }
 0x32c   :  { %v384_v8 = vpop.permute.xlu0 %383 }
 0x32d   :  { %v389_v9 = vsel %vm186_vm2, %v384_v8, 0 }
 0x32f   :  { %1463 = vmatmul.mubr.msk.bf16.vlgmr.msra.gmra.mrb[4].mxu1 %vm186_vm2, %v173_v50 }
 0x330   :  { %1473 = vmatpush3.bf16.xpose.msra.mxu1 %v389_v9  ;;  %v434_v10 = vpop.permute.xlu1 %433  ;;  %1474 = vmatprep.mubr.msk.bf16.mxu1 %vm1731_vm1, %v1730_v15  ;;  %v484_v12 = vpop.permute.xlu0 %483 }
 0x331   :  { %v439_v11 = vsel %vm186_vm2, %v434_v10, 0  ;;  %1469 = vmatmul.mubr.msk.bf16.vlgmr.msra.gmra.mrb[8].mxu0 %vm186_vm2, %v175_v52  ;;  %1484 = vmatprep.subr.bf16.mxu1 %v1730_v15  ;;  %v489_v14 = vsel %vm186_vm2, %v484_v12, 0 }
 0x332   :  { %1479 = vmatpush3.bf16.xpose.msra.mxu0 %v439_v11  ;;  %1480 = vmatprep.mubr.msk.bf16.mxu0 %vm1731_vm1, %v1730_v15 }
 0x333   :  { %1490 = vmatprep.subr.bf16.mxu0 %v1730_v15 }
 0x334   :  { %v534_v13 = vpop.permute.xlu1 %533 }
 0x335   :  { %v539_v16 = vsel %vm186_vm2, %v534_v13, 0 }
 0x337   :  { %1475 = vmatmul.mubr.msk.bf16.vlgmr.msra.gmra.mrb[8].mxu1 %vm186_vm2, %v177_v55 }
 0x338   :  { %1485 = vmatpush3.bf16.xpose.msra.mxu1 %v489_v14  ;;  %1486 = vmatprep.mubr.msk.bf16.mxu1 %vm1731_vm1, %v1730_v15 }
 0x339   :  { %1481 = vmatmul.mubr.msk.bf16.vlgmr.msra.gmra.mrb[12].mxu0 %vm186_vm2, %v179_v59  ;;  %1496 = vmatprep.subr.bf16.mxu1 %v1730_v15 }
 0x33a   :  { %1491 = vmatpush3.bf16.xpose.msra.mxu0 %v539_v16  ;;  %1492 = vmatprep.mubr.msk.bf16.mxu0 %vm1731_vm1, %v1730_v15 }
 0x33b   :  { %1502 = vmatprep.subr.bf16.mxu0 %v1730_v15 }
 0x33f   :  { %1487 = vmatmul.mubr.msk.bf16.vlgmr.msra.gmra.mrb[12].mxu1 %vm186_vm2, %v181_v54 }
 0x340   :  { %1498 = vmatprep.mubr.msk.bf16.mxu1 %vm1731_vm1, %v1730_v15 }
 0x341   :  { %1493 = vmatmul.mubr.msk.bf16.vlgmr.msra.gmra.mrb[16].mxu0 %vm186_vm2, %v183_v62 }
 0x342   :  { %1504 = vmatprep.mubr.msk.bf16.mxu0 %vm1731_vm1, %v1730_v15 }
 0x395   :  { %v227_v17 = vpop.f32.mrb[0].mxu1 }
 0x396   :  { %v1452_v18 = vpop.f32.mrb[1].mxu1  ;;  %v581_v19 = vsel %vm186_vm2, %v227_v17, -inf }
 0x397   :  { %v230_v20 = vpop.f32.mrb[2].mxu1  ;;  %582 = vmax.xlane.f32.xlu0 %v581_v19 }
 0x398   :  { %v1453_v21 = vpop.f32.mrb[3].mxu1 }
 0x39f   :  { %v275_v22 = vpop.f32.mrb[4].mxu0 }
 0x3a0   :  { %v1458_v23 = vpop.f32.mrb[5].mxu0  ;;  %v584_v25 = vsel %vm186_vm2, %v275_v22, -inf }
 0x3a1   :  { %585 = vmax.xlane.f32.xlu1 %v584_v25  ;;  %v278_v27 = vpop.f32.mrb[6].mxu0 }
 0x3a2   :  { %v1459_v28 = vpop.f32.mrb[7].mxu0 }
 0x402   :  { %v325_v29 = vpop.f32.mrb[4].mxu1 }
 0x403   :  { %v1464_v30 = vpop.f32.mrb[5].mxu1  ;;  %v587_v31 = vsel %vm186_vm2, %v325_v29, -inf }
 0x404   :  { %v328_v32 = vpop.f32.mrb[6].mxu1  ;;  %588 = vmax.xlane.f32.xlu0 %v587_v31  ;;  %v375_v33 = vpop.f32.mrb[8].mxu0 }
 0x405   :  { %v1465_v34 = vpop.f32.mrb[7].mxu1  ;;  %v1470_v35 = vpop.f32.mrb[9].mxu0  ;;  %v590_v38 = vsel %vm186_vm2, %v375_v33, -inf }
 0x406   :  { %v378_v36 = vpop.f32.mrb[10].mxu0 }
 0x407   :  { %v1471_v37 = vpop.f32.mrb[11].mxu0 }
 0x408   :  { %591 = vmax.xlane.f32.xlu0 %v590_v38 }
 0x40a   :  { %v1892_v39 = vpop.f32.mrb[8].mxu1 }
 0x40b   :  { %v1476_v40 = vpop.f32.mrb[9].mxu1  ;;  %v593_v41 = vsel %vm186_vm2, %v1892_v39, -inf }
 0x40c   :  { %v428_v42 = vpop.f32.mrb[10].mxu1  ;;  %594 = vmax.xlane.f32.xlu0 %v593_v41  ;;  %v475_v43 = vpop.f32.mrb[12].mxu0 }
 0x40d   :  { %v1477_v44 = vpop.f32.mrb[11].mxu1  ;;  %v1482_v45 = vpop.f32.mrb[13].mxu0  ;;  %v596_v47 = vsel %vm186_vm2, %v475_v43, -inf }
 0x40e   :  { %597 = vmax.xlane.f32.xlu1 %v596_v47  ;;  %v478_v48 = vpop.f32.mrb[14].mxu0 }
 0x40f   :  { %v1483_v50 = vpop.f32.mrb[15].mxu0 }
 0x412   :  { %v1897_v52 = vpop.f32.mrb[12].mxu1 }
 0x413   :  { %v1488_v54 = vpop.f32.mrb[13].mxu1  ;;  %v599_v55 = vsel %vm186_vm2, %v1897_v52, -inf }
 0x414   :  { %v528_v57 = vpop.f32.mrb[14].mxu1  ;;  %600 = vmax.xlane.f32.xlu0 %v599_v55  ;;  %v1901_v58 = vpop.f32.mrb[16].mxu0 }
 0x415   :  { %v1489_v59 = vpop.f32.mrb[15].mxu1  ;;  %v1494_v62 = vpop.f32.mrb[17].mxu0  ;;  %v602_v8 = vsel %vm186_vm2, %v1901_v58, -inf }
 0x416   :  { %v578_v2 = vpop.f32.mrb[18].mxu0 }
 0x417   :  { %v1495_v3 = vpop.f32.mrb[19].mxu0 }
 0x41f   :  { %726 = vrot.lane.b32.xlu1 %v1818_v49, %s1728_s0 }
 0x423   :  { %774 = vrot.lane.b32.xlu1 %v1828_v51, %s1728_s0 }
 0x424   :  { %v583_v4 = vpop.xlane.xlu0 %582 }
 0x425   :  { %v605_v5 = vsub.f32 %v227_v17, %v583_v4 }
 0x427   :  { %v613_v6 = vmul.f32 1.442695, %v605_v5 }
 0x429   :  { %1616 = vpow2.f32 %v613_v6 }
 0x42a   :  { %677 = vrot.lane.b32.xlu0 %v1816_v46, %s1728_s0 }
 0x42e   :  { %v586_v49 = vpop.xlane.xlu1 %585 }
 0x42f   :  { %v606_v51 = vsub.f32 %v275_v22, %v586_v49 }
 0x431   :  { %v615_v46 = vmul.f32 1.442695, %v606_v51 }
 0x433   :  { %v1909_v7 = vpop.eup %1616  ;;  %1618 = vpow2.f32 %v615_v46 }
 0x434   :  { %v629_v9 = vsel %vm186_vm2, %v1909_v7, 0.0 }
 0x43d   :  { %v1917_v10 = vpop.eup %1618 }
 0x43e   :  { %v632_v11 = vsel %vm186_vm2, %v1917_v10, 0.0 }
 0x447   :  { %603 = vmax.xlane.f32.xlu1 %v602_v8 }
 0x449   :  { %630 = vadd.xlane.f32.xlu0 %v629_v9 }
 0x458   :  { %822 = vrot.lane.b32.xlu1 %v1830_v53, %s1728_s0 }
 0x47c   :  { %633 = vadd.xlane.f32.xlu1 %v632_v11 }
 0x48d   :  { %918 = vrot.lane.b32.xlu1 %v1840_v61, %s1728_s0 }
 0x491   :  { %v589_v12 = vpop.xlane.xlu0 %588 }
 0x492   :  { %v607_v13 = vsub.f32 %v325_v29, %v589_v12 }
 0x494   :  { %v617_v14 = vmul.f32 1.442695, %v607_v13 }
 0x495   :  { %v592_v16 = vpop.xlane.xlu0 %591 }
 0x496   :  { %1620 = vpow2.f32 %v617_v14  ;;  %v608_v17 = vsub.f32 %v375_v33, %v592_v16 }
 0x498   :  { %v619_v19 = vmul.f32 1.442695, %v608_v17 }
 0x499   :  { %v595_v18 = vpop.xlane.xlu0 %594 }
 0x49a   :  { %1622 = vpow2.f32 %v619_v19  ;;  %v609_v34 = vsub.f32 %v1892_v39, %v595_v18 }
 0x49b   :  { %v598_v53 = vpop.xlane.xlu1 %597 }
 0x49c   :  { %v610_v20 = vsub.f32 %v475_v43, %v598_v53  ;;  %v621_v35 = vmul.f32 1.442695, %v609_v34 }
 0x49e   :  { %v623_v27 = vmul.f32 1.442695, %v610_v20 }
 0x49f   :  { %v727_v21 = vpop.permute.xlu1 %726 }
 0x4a0   :  { %v1923_v22 = vpop.eup %1620  ;;  %v732_v23 = vsel %vm682_vm3, %v727_v21, 0  ;;  %1624 = vpow2.f32 %v623_v27 }
 0x4a1   :  { %v601_v25 = vpop.xlane.xlu0 %600  ;;  %1503 = vmatpush3.bf16.msra.mxu0 %v732_v23  ;;  %v635_v61 = vsel %vm186_vm2, %v1923_v22, 0.0  ;;  %1626 = vpow2.f32 %v621_v35 }
 0x4a2   :  { %636 = vadd.xlane.f32.xlu0 %v635_v61  ;;  %1514 = vmatprep.subr.bf16.mxu0 %v1730_v15  ;;  %v611_v36 = vsub.f32 %v1897_v52, %v601_v25 }
 0x4a3   :  { %v775_v38 = vpop.permute.xlu1 %774 }
 0x4a4   :  { %v1931_v30 = vpop.eup %1622  ;;  %v625_v37 = vmul.f32 1.442695, %v611_v36  ;;  %v780_v55 = vsel %vm682_vm3, %v775_v38, 0 }
 0x4a5   :  { %v678_v28 = vpop.permute.xlu0 %677  ;;  %v638_v31 = vsel %vm186_vm2, %v1931_v30, 0.0 }
 0x4a6   :  { %v684_v29 = vsel %vm682_vm3, %v678_v28, 0  ;;  %1628 = vpow2.f32 %v625_v37 }
 0x4a7   :  { %1497 = vmatpush3.bf16.msra.mxu1 %v684_v29 }
 0x4a8   :  { %1508 = vmatprep.subr.bf16.mxu1 %v1730_v15 }
 0x4aa   :  { %v1935_v32 = vpop.eup %1624 }
 0x4ab   :  { %v644_v33 = vsel %vm186_vm2, %v1935_v32, 0.0  ;;  %v1943_v40 = vpop.eup %1626 }
 0x4ac   :  { %v641_v44 = vsel %vm186_vm2, %v1943_v40, 0.0 }
 0x4b0   :  { %v1948_v45 = vpop.eup %1628 }
 0x4b1   :  { %639 = vadd.xlane.f32.xlu1 %v638_v31  ;;  %v647_v39 = vsel %vm186_vm2, %v1948_v45, 0.0 }
 0x4b5   :  { %645 = vadd.xlane.f32.xlu1 %v644_v33 }
 0x4b8   :  { %870 = vrot.lane.b32.xlu0 %v1834_v56, %s1728_s0 }
 0x4d4   :  { %v604_v41 = vpop.xlane.xlu1 %603 }
 0x4d5   :  { %v612_v42 = vsub.f32 %v1901_v58, %v604_v41 }
 0x4d6   :  { %v631_v43 = vpop.xlane.xlu0 %630 }
 0x4d7   :  { %v627_v56 = vmul.f32 1.442695, %v612_v42  ;;  %1630 = vrcp.f32 %v631_v43  ;;  %642 = vadd.xlane.f32.xlu0 %v641_v44 }
 0x4d8   :  { %v823_v57 = vpop.permute.xlu1 %822 }
 0x4d9   :  { %1632 = vpow2.f32 %v627_v56  ;;  %v828_v3 = vsel %vm682_vm3, %v823_v57, 0  ;;  %v1604_v57 = vld [vmem:[#allocation5 + $0x10] sm:$0xff]  }
 0x4db   :  { %648 = vadd.xlane.f32.xlu0 %v647_v39 }
 0x4e1   :  { %v1631_v47 = vpop.eup %1630 }
 0x4e2   :  { %v661_v48 = vmul.f32 %v1631_v47, %v1909_v7 }
 0x4e3   :  { %v1953_v50 = vpop.eup %1632 }
 0x4e4   :  { %v650_v52 = vsel %vm186_vm2, %v1953_v50, 0.0  ;;  %v669_v54 = vpack.c.bf16 %v661_v48, %v661_v48 }
 0x4e5   :  { %651 = vadd.xlane.f32.xlu1 %v650_v52 }
 0x4e6   :  { %1499 = vmatmul.mubr.msk.bf16.vlgmr.msra.gmra.mrb[16].mxu1 %vm186_vm2, %v669_v54 }
 0x4e7   :  { %1509 = vmatpush3.bf16.msra.mxu1 %v780_v55  ;;  %1510 = vmatprep.mubr.msk.bf16.mxu1 %vm1731_vm1, %v1730_v15 }
 0x4e8   :  { %1520 = vmatprep.subr.bf16.mxu1 %v1730_v15 }
 0x4f1   :  { %966 = vrot.lane.b32.xlu0 %v1838_v60, %s1728_s0 }
 0x4f6   :  { %1014 = vrot.lane.b32.xlu1 %v1845_v63, %s1728_s0 }
 0x509   :  { %v634_v58 = vpop.xlane.xlu1 %633 }
 0x50a   :  { %1634 = vrcp.f32 %v634_v58 }
 0x50d   :  { %v919_v4 = vpop.permute.xlu1 %918 }
 0x50e   :  { %v924_v12 = vsel %vm682_vm3, %v919_v4, 0 }
 0x514   :  { %v1635_v59 = vpop.eup %1634 }
 0x515   :  { %v662_v62 = vmul.f32 %v1635_v59, %v1917_v10 }
 0x517   :  { %v670_v2 = vpack.c.bf16 %v662_v62, %v662_v62 }
 0x519   :  { %1505 = vmatmul.mubr.msk.bf16.vlgmr.msra.gmra.mrb[20].mxu0 %vm186_vm2, %v670_v2 }
 0x51a   :  { %1515 = vmatpush3.bf16.msra.mxu0 %v828_v3  ;;  %1516 = vmatprep.mubr.msk.bf16.mxu0 %vm1731_vm1, %v1730_v15 }
 0x51b   :  { %1526 = vmatprep.subr.bf16.mxu0 %v1730_v15 }
 0x52f   :  { %v637_v60 = vpop.xlane.xlu0 %636 }
 0x530   :  { %1636 = vrcp.f32 %v637_v60  ;;  %v1605_v60 = vld [vmem:[#allocation5 + $0x18] sm:$0xff]  }
 0x533   :  { %v871_v6 = vpop.permute.xlu0 %870 }
 0x534   :  { %v876_v9 = vsel %vm682_vm3, %v871_v6, 0 }
 0x53a   :  { %v1637_v63 = vpop.eup %1636 }
 0x53b   :  { %v663_v5 = vmul.f32 %v1637_v63, %v1923_v22 }
 0x53d   :  { %v671_v7 = vpack.c.bf16 %v663_v5, %v663_v5 }
 0x53e   :  { %v640_v8 = vpop.xlane.xlu1 %639 }
 0x53f   :  { %1638 = vrcp.f32 %v640_v8  ;;  %1511 = vmatmul.mubr.msk.bf16.vlgmr.msra.gmra.mrb[20].mxu1 %vm186_vm2, %v671_v7 }
 0x540   :  { %1521 = vmatpush3.bf16.msra.mxu1 %v876_v9  ;;  %1522 = vmatprep.mubr.msk.bf16.mxu1 %vm1731_vm1, %v1730_v15 }
 0x541   :  { %1532 = vmatprep.subr.bf16.mxu1 %v1730_v15 }
 0x542   :  { %v646_v49 = vpop.xlane.xlu1 %645 }
 0x543   :  { %1640 = vrcp.f32 %v646_v49 }
 0x549   :  { %v1639_v51 = vpop.eup %1638 }
 0x54a   :  { %v664_v46 = vmul.f32 %v1639_v51, %v1931_v30 }
 0x54c   :  { %v672_v10 = vpack.c.bf16 %v664_v46, %v664_v46 }
 0x54d   :  { %v1641_v11 = vpop.eup %1640 }
 0x54e   :  { %1517 = vmatmul.mubr.msk.bf16.vlgmr.msra.gmra.mrb[24].mxu0 %vm186_vm2, %v672_v10  ;;  %v666_v13 = vmul.f32 %v1641_v11, %v1935_v32 }
 0x54f   :  { %1527 = vmatpush3.bf16.msra.mxu0 %v924_v12  ;;  %1528 = vmatprep.mubr.msk.bf16.mxu0 %vm1731_vm1, %v1730_v15 }
 0x550   :  { %1538 = vmatprep.subr.bf16.mxu0 %v1730_v15  ;;  %v674_v14 = vpack.c.bf16 %v666_v13, %v666_v13 }
 0x556   :  { %1529 = vmatmul.mubr.msk.bf16.vlgmr.msra.gmra.mrb[28].mxu0 %vm186_vm2, %v674_v14 }
 0x557   :  { %1540 = vmatprep.mubr.msk.bf16.mxu0 %vm1731_vm1, %v1730_v15 }
 0x564   :  { %v643_v16 = vpop.xlane.xlu0 %642 }
 0x565   :  { %1642 = vrcp.f32 %v643_v16 }
 0x568   :  { %v649_v17 = vpop.xlane.xlu0 %648 }
 0x569   :  { %1644 = vrcp.f32 %v649_v17 }
 0x56c   :  { %v967_v19 = vpop.permute.xlu0 %966 }
 0x56d   :  { %v972_v23 = vsel %vm682_vm3, %v967_v19, 0 }
 0x56f   :  { %v1643_v53 = vpop.eup %1642 }
 0x570   :  { %v665_v18 = vmul.f32 %v1643_v53, %v1943_v40 }
 0x572   :  { %v652_v20 = vpop.xlane.xlu1 %651  ;;  %v673_v21 = vpack.c.bf16 %v665_v18, %v665_v18 }
 0x573   :  { %v1645_v22 = vpop.eup %1644  ;;  %1646 = vrcp.f32 %v652_v20 }
 0x574   :  { %1523 = vmatmul.mubr.msk.bf16.vlgmr.msra.gmra.mrb[24].mxu1 %vm186_vm2, %v673_v21  ;;  %v667_v25 = vmul.f32 %v1645_v22, %v1948_v45 }
 0x575   :  { %1533 = vmatpush3.bf16.msra.mxu1 %v972_v23  ;;  %1534 = vmatprep.mubr.msk.bf16.mxu1 %vm1731_vm1, %v1730_v15 }
 0x576   :  { %v1015_v61 = vpop.permute.xlu1 %1014  ;;  %1544 = vmatprep.subr.bf16.mxu1 %v1730_v15  ;;  %v675_v28 = vpack.c.bf16 %v667_v25, %v667_v25 }
 0x577   :  { %v1020_v27 = vsel %vm682_vm3, %v1015_v61, 0  ;;  %v1097_v61 = vsub.s32 1, %v1803_v24 }
 0x578   :  { %1539 = vmatpush3.bf16.msra.mxu0 %v1020_v27 }
 0x579   :  { %1552 = vmatprep.subr.bf16.mxu0 %v1730_v15  ;;  %v1098_v27 = vrot.slane %v1805_v26, %v1097_v61 }
 0x57c   :  { %1535 = vmatmul.mubr.msk.bf16.vlgmr.msra.gmra.mrb[28].mxu1 %vm186_vm2, %v675_v28 }
 0x57d   :  { %v1647_v29 = vpop.eup %1646  ;;  %1548 = vmatprep.mubr.msk.bf16.mxu1 %vm1731_vm1, %v1730_v15  ;;  %1545 = vmatpush3.bf16.msra.mxu1 %v1604_v57 }
 0x57e   :  { %v668_v30 = vmul.f32 %v1647_v29, %v1953_v50  ;;  %1546 = vmatprep.subr.bf16.mxu1 %v1730_v15 }
 0x580   :  { %v676_v31 = vpack.c.bf16 %v668_v30, %v668_v30 }
 0x581   :  { %1547 = vmatpush3.bf16.msra.mxu1 %v1605_v60 }
 0x582   :  { %1541 = vmatmul.mubr.msk.bf16.vlgmr.msra.gmra.mrb[32].mxu0 %vm186_vm2, %v676_v31  ;;  %1560 = vmatprep.subr.bf16.mxu1 %v1730_v15 }
 0x583   :  { %1556 = vmatprep.mubr.msk.bf16.mxu0 %vm1731_vm1, %v1730_v15 }
 0x5b9   :  { %v720_v32 = vpop.f32.mrb[16].mxu1 }
 0x5ba   :  { %v1500_v33 = vpop.f32.mrb[17].mxu1 }
 0x5bb   :  { %v723_v34 = vpop.f32.mrb[18].mxu1 }
 0x5bc   :  { %v1501_v35 = vpop.f32.mrb[19].mxu1 }
 0x5ec   :  { %v768_v36 = vpop.f32.mrb[20].mxu0 }
 0x5ed   :  { %v1506_v37 = vpop.f32.mrb[21].mxu0 }
 0x5ee   :  { %v771_v38 = vpop.f32.mrb[22].mxu0 }
 0x5ef   :  { %v1507_v40 = vpop.f32.mrb[23].mxu0 }
 0x612   :  { %v816_v41 = vpop.f32.mrb[20].mxu1 }
 0x613   :  { %v1512_v42 = vpop.f32.mrb[21].mxu1 }
 0x614   :  { %v819_v43 = vpop.f32.mrb[22].mxu1 }
 0x615   :  { %v1513_v44 = vpop.f32.mrb[23].mxu1 }
 0x621   :  { %v864_v45 = vpop.f32.mrb[24].mxu0 }
 0x622   :  { %v1587_v56 = vpack.i.bf16 %v864_v45, %v816_v41  ;;  %v1518_v39 = vpop.f32.mrb[25].mxu0 }
 0x623   :  { %v867_v47 = vpop.f32.mrb[26].mxu0  ;;  %v1606_v39 = vld [vmem:[#allocation5 + $0x20] sm:$0xff]  }
 0x624   :  { %1588 = vrot.lane.b32.xlu0 %v1587_v56, %s1726_s20  ;;  %v1519_v48 = vpop.f32.mrb[27].mxu0  ;;  %1553 = vmatpush3.bf16.msra.mxu0 %v1606_v39  ;;  %v1607_v47 = vld [vmem:[#allocation5 + $0x28] sm:$0xff]  }
 0x625   :  { %1554 = vmatprep.subr.bf16.mxu0 %v1730_v15  ;;  %v1608_v48 = vld [vmem:[#allocation5 + $0x30] sm:$0xff]  }
 0x628   :  { %1555 = vmatpush3.bf16.msra.mxu0 %v1607_v47 }
 0x629   :  { %v960_v50 = vpop.f32.mrb[28].mxu0 }
 0x62a   :  { %v1530_v52 = vpop.f32.mrb[29].mxu0 }
 0x62b   :  { %v963_v54 = vpop.f32.mrb[30].mxu0 }
 0x62c   :  { %v1531_v55 = vpop.f32.mrb[31].mxu0 }
 0x647   :  { %v912_v58 = vpop.f32.mrb[24].mxu1 }
 0x648   :  { %v1592_v59 = vpack.i.bf16 %v960_v50, %v912_v58  ;;  %v1524_v62 = vpop.f32.mrb[25].mxu1  ;;  %v1609_v50 = vld [vmem:[#allocation5 + $0x38] sm:$0xff]  }
 0x649   :  { %v915_v2 = vpop.f32.mrb[26].mxu1  ;;  %v1185_v62 = vsub.s32 4, %v1803_v24 }
 0x64a   :  { %v1525_v3 = vpop.f32.mrb[27].mxu1  ;;  %1593 = vrot.lane.b32.xlu1 %v1592_v59, %s1736_s11 }
 0x64b   :  { %v1186_v3 = vrot.slane %v1805_v26, %v1185_v62 }
 0x64f   :  { %v1008_v63 = vpop.f32.mrb[28].mxu1 }
 0x650   :  { %v1536_v4 = vpop.f32.mrb[29].mxu1 }
 0x651   :  { %v1011_v5 = vpop.f32.mrb[30].mxu1 }
 0x652   :  { %v1537_v6 = vpop.f32.mrb[31].mxu1 }
 0x655   :  { %v1056_v7 = vpop.f32.mrb[32].mxu0 }
 0x656   :  { %v1597_v8 = vpack.i.bf16 %v1056_v7, %v1008_v63  ;;  %v1542_v9 = vpop.f32.mrb[33].mxu0  ;;  %v1191_v63 = vsub.s32 5, %v1803_v24 }
 0x657   :  { %v1059_v49 = vpop.f32.mrb[34].mxu0 }
 0x658   :  { %1598 = vrot.lane.b32.xlu0 %v1597_v8, %s1737_s12  ;;  %v1543_v51 = vpop.f32.mrb[35].mxu0  ;;  %v1192_v7 = vrot.slane %v1805_v26, %v1191_v63 }
 0x696   :  { %v1589_v46 = vpop.permute.xlu0 %1588 }
 0x697   :  { %v1591_v11 = vunpack.i.h.bf16 %v1589_v46  ;;  %v1590_v12 = vunpack.i.l.bf16 %v1589_v46  ;;  %v1610_v46 = vld [vmem:[#allocation5 + $0x40] sm:$0xff]  }
 0x699   :  { %v1087_v17 = vsel %vm186_vm2, %v768_v36, %v1591_v11  ;;  %v1086_v53 = vsel %vm186_vm2, %v720_v32, %v1590_v12  ;;  %v1198_v11 = vsub.s32 7, %v1803_v24 }
 0x69b   :  { %v1199_v12 = vrot.slane %v1805_v26, %v1198_v11 }
 0x6bc   :  { %v1594_v10 = vpop.permute.xlu1 %1593 }
 0x6bd   :  { %v1596_v13 = vunpack.i.h.bf16 %v1594_v10  ;;  %v1595_v14 = vunpack.i.l.bf16 %v1594_v10  ;;  %v1611_v10 = vld [vmem:[#allocation5 + $0x48] sm:$0xff]  }
 0x6bf   :  { %v1090_v20 = vsel %vm1088_vm4, %v1087_v17, %v1596_v13  ;;  %v1089_v21 = vsel %vm1088_vm4, %v1086_v53, %v1595_v14 }
 0x6ca   :  { %v1599_v16 = vpop.permute.xlu0 %1598 }
 0x6cb   :  { %v1601_v18 = vunpack.i.h.bf16 %v1599_v16  ;;  %v1600_v19 = vunpack.i.l.bf16 %v1599_v16 }
 0x6cd   :  { %v1093_v22 = vsel %vm1091_vm5, %v1090_v20, %v1601_v18  ;;  %v1092_v23 = vsel %vm1091_vm5, %v1089_v21, %v1600_v19 }
 0x6ce   :  { %v1094_v25 = vpack.c.bf16 %v1093_v22, %v1092_v23  ;;  %v1261_v22 = vsub.s32 6, %v1803_v24 }
 0x6d0   :  { %1549 = vmatmul.mubr.msk.bf16.vlgmr.msra.gmra.mrb[32].mxu1 %vm65_vm0, %v1094_v25 }
 0x6d1   :  { %1568 = vmatprep.mubr.msk.bf16.mxu1 %vm1731_vm1, %v1730_v15  ;;  %1561 = vmatpush3.bf16.msra.mxu1 %v1608_v48 }
 0x6d2   :  { %1562 = vmatprep.subr.bf16.mxu1 %v1730_v15 }
 0x6d5   :  { %1563 = vmatpush3.bf16.msra.mxu1 %v1609_v50 }
 0x6d6   :  { %1564 = vmatprep.subr.bf16.mxu1 %v1730_v15 }
 0x6d9   :  { %1565 = vmatpush3.bf16.msra.mxu1 %v1610_v46 }
 0x6da   :  { %1566 = vmatprep.subr.bf16.mxu1 %v1730_v15  ;;  %v1262_v15 = vrot.slane %v1805_v26, %v1261_v22 }
 0x6dd   :  { %1567 = vmatpush3.bf16.msra.mxu1 %v1611_v10 }
 0x7a3   :  { %v1148_v28 = vpop.f32.mrb[32].mxu1 }
 0x7a4   :  { %v1149_v29 = vadd.f32 %v1148_v28, %v1098_v27  ;;  %v1550_v30 = vpop.f32.mrb[33].mxu1 }
 0x7a5   :  { %v1151_v31 = vpop.f32.mrb[34].mxu1 }
 0x7a6   :  { %v2015_v32 = vadd.f32 %v1149_v29, %v1783_v0  ;;  %v1152_v33 = vadd.f32 %v1151_v31, %v1098_v27  ;;  %v1551_v34 = vpop.f32.mrb[35].mxu1 }
 0x7a8   :  { %v2018_v35 = vadd.f32 %v1152_v33, %v1785_v1  ;;  %v1157_v36 = vsel %vm65_vm0, %v2015_v32, 0.0 }
 0x7a9   :  { %1158 = vadd.xlane.f32.xlu1 %v1157_v36 }
 0x7aa   :  { %v1160_v37 = vsel %vm65_vm0, %v2018_v35, 0.0 }
 0x7ab   :  { %1161 = vadd.xlane.f32.xlu0 %v1160_v37 }
 0x836   :  { %v1159_v38 = vpop.xlane.xlu1 %1158 }
 0x837   :  { %v1163_v40 = vmul.f32 0.03125, %v1159_v38 }
 0x838   :  { %v1162_v41 = vpop.xlane.xlu0 %1161 }
 0x839   :  { %v1165_v42 = vsub.f32 %v2015_v32, %v1163_v40  ;;  %v1164_v0 = vmul.f32 0.03125, %v1162_v41 }
 0x83b   :  { %v1166_v43 = vsub.f32 %v2018_v35, %v1164_v0  ;;  %v1167_v44 = vmul.f32 %v1165_v42, %v1165_v42 }
 0x83d   :  { %v1169_v1 = vsel %vm65_vm0, %v1167_v44, 0.0  ;;  %v1168_v45 = vmul.f32 %v1166_v43, %v1166_v43 }
 0x83e   :  { %1170 = vadd.xlane.f32.xlu0 %v1169_v1 }
 0x83f   :  { %v1172_v56 = vsel %vm65_vm0, %v1168_v45, 0.0 }
 0x842   :  { %1173 = vadd.xlane.f32.xlu0 %v1172_v56 }
 0x8cb   :  { %v1171_v52 = vpop.xlane.xlu0 %1170 }
 0x8cc   :  { %v1175_v54 = vmul.f32 0.03125, %v1171_v52 }
 0x8ce   :  { %v1177_v55 = vadd.f32 1e-05, %v1175_v54 }
 0x8cf   :  { %v1174_v57 = vpop.xlane.xlu0 %1173 }
 0x8d0   :  { %1648 = vrsqrt.f32 %v1177_v55  ;;  %v1176_v58 = vmul.f32 0.03125, %v1174_v57 }
 0x8d2   :  { %v1178_v59 = vadd.f32 1e-05, %v1176_v58 }
 0x8d4   :  { %1650 = vrsqrt.f32 %v1178_v59 }
 0x8da   :  { %v1649_v2 = vpop.eup %1648 }
 0x8db   :  { %v1181_v60 = vmul.f32 %v1649_v2, %v1165_v42 }
 0x8dd   :  { %v1187_v5 = vmul.f32 %v1186_v3, %v1181_v60 }
 0x8de   :  { %v1651_v4 = vpop.eup %1650 }
 0x8df   :  { %v1182_v6 = vmul.f32 %v1651_v4, %v1166_v43  ;;  %v1193_v9 = vadd.f32 %v1192_v7, %v1187_v5 }
 0x8e1   :  { %v1188_v8 = vmul.f32 %v1186_v3, %v1182_v6 }
 0x8e3   :  { %v1194_v49 = vadd.f32 %v1192_v7, %v1188_v8 }
 0x8e5   :  { %v1195_v51 = vpack.c.bf16 %v1194_v49, %v1193_v9 }
 0x8e7   :  { %1557 = vmatmul.mubr.msk.bf16.vlgmr.msra.gmra.mrb[36].mxu0 %vm65_vm0, %v1195_v51 }
 0x9ba   :  { %v1249_v13 = vpop.f32.mrb[36].mxu0 }
 0x9bb   :  { %v1250_v14 = vadd.f32 %v1249_v13, %v1199_v12  ;;  %v1558_v16 = vpop.f32.mrb[37].mxu0 }
 0x9bc   :  { %v1252_v17 = vpop.f32.mrb[38].mxu0 }
 0x9bd   :  { %v1253_v53 = vadd.f32 %v1252_v17, %v1199_v12  ;;  %v1559_v18 = vpop.f32.mrb[39].mxu0  ;;  %v1256_v19 = vmax.f32 %v1250_v14, 0.0 }
 0x9bf   :  { %v1257_v20 = vmax.f32 %v1253_v53, 0.0 }
 0x9c1   :  { %v1258_v21 = vpack.c.bf16 %v1257_v20, %v1256_v19 }
 0x9c3   :  { %1569 = vmatmul.mubr.msk.bf16.vlgmr.msra.gmra.mrb[36].mxu1 %vm1287_vm6, %v1258_v21 }
 0xa96   :  { %v1325_v23 = vpop.f32.mrb[36].mxu1 }
 0xa97   :  { %v1326_v25 = vadd.f32 %v1325_v23, %v1262_v15  ;;  %v1570_v61 = vpop.f32.mrb[37].mxu1 }
 0xa98   :  { %v1328_v27 = vpop.f32.mrb[38].mxu1 }
 0xa99   :  { %v1332_v28 = vadd.f32 %v1326_v25, %v2015_v32  ;;  %v1329_v29 = vadd.f32 %v1328_v27, %v1262_v15  ;;  %v1571_v30 = vpop.f32.mrb[39].mxu1 }
 0xa9b   :  { %1334 = vst.msk [vmem:[#allocation7] sm:$0xff] %vm65_vm0, %v1332_v28  ;;  %v1333_v31 = vadd.f32 %v1329_v29, %v2018_v35 }
 0xa9d   :  { %1335 = vst.msk [vmem:[#allocation7 + $0x8] sm:$0xff] %vm65_vm0, %v1333_v31 }
 0xa9e   :  { %1707 = shalt.err (!%p1704_p6)
}
 0xa9f   :  { %s1708_s18 = scalar_lea.hbm %s2062_s2, 256 }
 0xaa0   :  { %p1709_p7 = scmp.ne.s32.totalorder %s2062_s2, %s1708_s18  ;;  %p1712_p8 = scmp.lt.u32.totalorder %s1708_s18, %s2062_s2 }
 0xaa2   :  { %p1714_p9 = pnand %p1712_p8, %p1709_p7 }
 0xaa4   :  { %1717 = shalt.err (!%p1714_p9)
}
 0xaa5   :  { %1347 = dma.vmem_to_hbm [thread:$0]  %s1342_s14, 256, %s2062_s2, [#allocation4], %s1725_s19, %s1725_s19, %s1726_s20  }
 0xaa6   :  { %1722 = dma.done.wait [#allocation4], 256  }
 0xaa7   :  { %1723 = vsyncadd [#allocation4], 4294967040 }
 0xaa8   :  { %1351 = vsyncpa [#allocation3], 1 }
 0xaa9   :  { %1352 = vsyncpa [#allocation6], 1 }
 0xaaa   :  { %1353 = vsyncpa [#allocation4], 1 }

</bundles_post_ra>
